<compile_context>
chip_gen: v5e
topology: v5e:2x2
jax: 0.10.0
libtpu: 0.0.40
codegen_flags: <defaults>
</compile_context>

<pallas_src>
import numpy as np
import jax
import jax.numpy as jnp
from jax.experimental import pallas as pl
from jax.experimental.pallas import tpu as pltpu

VOCAB = 64
EMB_DIM = 32        # the torch index_copy into a [size, encode_dim] buffer forces emb==enc
ENCODE_DIM = 32
DPAD = 128          # lane-dense feature axis (pad 32 -> 128)
VPAD = 128          # vocab padded so the onehot / F tiles are lane-dense
KW = 128            # lane width of the per-level index rows / staging K dim


def _round_up(x, m):
    return ((x + m - 1) // m) * m


# ----------------------- host-side schedule construction --------------------
# (data-dependent Python recursion == glue; mirrors the torch traverse_mul exactly)

def _build_schedule(node, batch_index, calls):
    size = len(node)
    if size == 0:
        return None
    index, children_index = [], []
    current_node, children = [], []
    for i in range(size):
        if node[i][0] != -1:
            index.append(i)
            current_node.append(node[i][0])
            temp = node[i][1:]
            for j in range(len(temp)):
                if temp[j][0] != -1:
                    if len(children_index) <= j:
                        children_index.append([i])
                        children.append([temp[j]])
                    else:
                        children_index[j].append(i)
                        children[j].append(temp[j])
        else:
            batch_index[i] = -1
    ids = [-1] * size
    for pos, i in enumerate(index):
        ids[i] = current_node[pos]
    edges = []
    for c in range(len(children)):
        bci = [batch_index[i] for i in children_index[c]]
        child_call = _build_schedule(children[c], bci, calls)
        if child_call is not None:
            edges.append((child_call, list(children_index[c])))
    kept = [i for i in batch_index if i != -1]
    append = kept if len(kept) == size else None
    calls.append({"ids": ids, "edges": edges, "append": append})   # post-order: children first
    return len(calls) - 1


def _pack_schedule(calls):
    L = len(calls)
    SMAX = max(8, _round_up(max(len(c["ids"]) for c in calls), 8))
    EMAX = max(1, max(len(c["edges"]) for c in calls))
    S_total = L * SMAX
    ids_flat = np.full((S_total, 1), -1, np.int32)
    edge_src = np.full((L * EMAX,), -1, np.int32)    # flat 1-D for SMEM (-1 == no edge)
    append_flag = np.zeros((L,), np.int32)
    # per-level index rows, one (8,128) int32 tile per level (dynamic leading-axis indexed):
    #   sublane 0: flattened edge destinations (edge e occupies lanes [e*SMAX, e*SMAX+SMAX))
    #   sublane 1: batch row per local row for the node_list append
    lvl_idx = np.full((L, 8, KW), -1, np.int32)
    for c, call in enumerate(calls):
        n = len(call["ids"])
        ids_flat[c * SMAX:c * SMAX + n, 0] = call["ids"]
        for e, (src, dests) in enumerate(call["edges"]):
            edge_src[c * EMAX + e] = src
            lvl_idx[c, 0, e * SMAX:e * SMAX + len(dests)] = dests
        if call["append"] is not None:
            append_flag[c] = 1
            lvl_idx[c, 1, :n] = call["append"]
    return (jnp.asarray(ids_flat), jnp.asarray(edge_src), jnp.asarray(append_flag),
            jnp.asarray(lvl_idx), L, SMAX, EMAX)


# ------------------------------ fused Pallas kernel --------------------------

def _make_fused_kernel(L, SMAX, EMAX, S_total, BS_pad, chunk):
    def kernel(edge_src_ref, append_ref,               # SMEM int32: [L*EMAX], [L]
               ids_ref, idx_ref, f_ref, bc_ref,        # VMEM inputs
               out_ref,                                 # [BS_pad, DPAD] running max (output)
               acc_ref, stage_ref):                     # VMEM scratch
        # ---- phase 0: embedding + W_c for EVERY row of EVERY level, in chunked matmuls ----
        out_ref[...] = jnp.full((BS_pad, DPAD), -jnp.inf, jnp.float32)
        stage_ref[...] = jnp.zeros((KW, DPAD), jnp.float32)
        for c0 in range(0, S_total, chunk):
            csz = min(chunk, S_total - c0)
            ids = ids_ref[c0:c0 + csz, :]                                   # [csz, 1]
            onehot = (ids == jax.lax.broadcasted_iota(jnp.int32, (csz, VPAD), 1)
                      ).astype(jnp.float32)
            acc_ref[c0:c0 + csz, :] = (
                jnp.dot(onehot, f_ref[...], preferred_element_type=jnp.float32)
                + bc_ref[...])                                              # id==-1 -> bias

        # ---- phase 1: single in-kernel pass over the (post-order) level schedule ----
        @pl.loop(0, L)
        def _level(t):
            rows = idx_ref[t]                                               # [8, KW] int32
            dst = pl.ds(pl.multiple_of(t * SMAX, SMAX), SMAX)
            has_edge = edge_src_ref[t * EMAX] >= 0                          # edges packed from 0

            # fused scatter-add of ALL child levels of this level (one matmul per level)
            @pl.when(has_edge)
            def _scatter_children():
                for e in range(EMAX):
                    src = jnp.maximum(edge_src_ref[t * EMAX + e], 0)        # clamp: no-edge -> 0
                    soff = pl.multiple_of(src * SMAX, SMAX)
                    stage_ref[e * SMAX:(e + 1) * SMAX, :] = acc_ref[pl.ds(soff, SMAX), :]
                erow = rows[0:1, :]                                         # [1, KW] dests (-1 pad)
                scat = (jax.lax.broadcasted_iota(jnp.int32, (SMAX, KW), 0) == erow
                        ).astype(jnp.float32)                               # [dst, staged-src]
                acc_ref[dst, :] = acc_ref[dst, :] + jnp.dot(
                    scat, stage_ref[...], preferred_element_type=jnp.float32)

            # node_list index_copy into zeros[bs, D] + running element-wise max, in-kernel
            @pl.when(append_ref[t] != 0)
            def _append():
                brow = rows[1:2, 0:SMAX]                                    # [1, SMAX]
                scat = (jax.lax.broadcasted_iota(jnp.int32, (BS_pad, SMAX), 0) == brow
                        ).astype(jnp.float32)                               # [BS_pad, SMAX]
                node = jnp.dot(scat, acc_ref[dst, :],
                               preferred_element_type=jnp.float32)          # zeros elsewhere
                out_ref[...] = jnp.maximum(out_ref[...], node)

    return kernel


def fused_tree_forward(schedule, f_pad, bc_pad, bs):
    ids_flat, edge_src, append_flag, lvl_idx, L, SMAX, EMAX = schedule
    if not bool(np.any(np.asarray(append_flag))):
        # torch.stack([]) would raise in the original module; mirror that instead of -inf.
        raise ValueError("BatchTreeEncoder: no full level was appended to node_list")
    if EMAX * SMAX > KW or SMAX > KW:
        # TODO(synk): tile the edge-destination row over multiple sublanes for very wide levels.
        raise NotImplementedError("level width * arity exceeds one 128-lane index row")

    BS_pad = max(8, _round_up(bs, 8))
    S_total = L * SMAX
    chunk = 256                                   # init matmul chunk (rows); bounds vreg pressure
    kernel = _make_fused_kernel(L, SMAX, EMAX, S_total, BS_pad, chunk)

    # explicit VMEM budget: acc + staging + F + ids + index rows + out, with 2x headroom
    vmem_needed = (S_total * DPAD * 4 + KW * DPAD * 4 + VPAD * DPAD * 4 + DPAD * 4
                   + S_total * 128 * 4 + L * 8 * KW * 4 + BS_pad * DPAD * 4)
    vmem_limit = int(min(max(2 * vmem_needed + (2 << 20), 16 << 20), 64 << 20))

    out = pl.pallas_call(
        kernel,
        out_shape=jax.ShapeDtypeStruct((BS_pad, DPAD), jnp.float32),
        in_specs=[
            pl.BlockSpec(memory_space=pltpu.MemorySpace.SMEM),   # edge_src  (flat 1-D)
            pl.BlockSpec(memory_space=pltpu.MemorySpace.SMEM),   # append_flag
            pl.BlockSpec(memory_space=pltpu.MemorySpace.VMEM),   # ids
            pl.BlockSpec(memory_space=pltpu.MemorySpace.VMEM),   # per-level index rows
            pl.BlockSpec(memory_space=pltpu.MemorySpace.VMEM),   # fused emb @ W_c^T
            pl.BlockSpec(memory_space=pltpu.MemorySpace.VMEM),   # bias
        ],
        out_specs=pl.BlockSpec(memory_space=pltpu.MemorySpace.VMEM),
        scratch_shapes=[pltpu.VMEM((S_total, DPAD), jnp.float32),   # all levels' activations
                        pltpu.VMEM((KW, DPAD), jnp.float32)],       # child staging
        compiler_params=pltpu.CompilerParams(vmem_limit_bytes=vmem_limit),
    )(edge_src, append_flag, ids_flat, lvl_idx, f_pad, bc_pad)
    return out[:bs, :ENCODE_DIM]


# --------------------------- module equivalent ------------------------------

class BatchTreeEncoderPallas:
    def __init__(self, vocab_size, embedding_dim, encode_dim, batch_size, key):
        assert embedding_dim == encode_dim
        k0, k1, k2 = jax.random.split(key, 3)
        # deterministic synthetic parameters (no checkpoint load)
        self.embedding = (0.1 * jax.random.normal(k0, (vocab_size, embedding_dim))
                          ).astype(jnp.float32)
        w_c = (0.1 * jax.random.normal(k1, (encode_dim, embedding_dim))).astype(jnp.float32)
        self.wc_t = jnp.transpose(w_c)                                    # [emb, enc]
        self.bc = (0.1 * jax.random.normal(k2, (1, encode_dim))).astype(jnp.float32)
        # fused table F = embedding @ W_c^T (f64 on host to minimize drift), lane-dense pad
        f = (np.asarray(self.embedding, np.float64) @ np.asarray(self.wc_t, np.float64)
             ).astype(np.float32)
        f_pad = np.zeros((VPAD, DPAD), np.float32)
        f_pad[:vocab_size, :encode_dim] = f
        bc_pad = np.zeros((1, DPAD), np.float32)
        bc_pad[0, :encode_dim] = np.asarray(self.bc, np.float32)[0]
        self.f_pad = jnp.asarray(f_pad)
        self.bc_pad = jnp.asarray(bc_pad)
        # TODO(synk): W_l / W_r / relu are declared in the torch __init__ but never used in
        # forward(); they are intentionally not materialized here.
        self.encode_dim = encode_dim
        self.batch_size = batch_size

    def forward(self, x, bs):
        self.batch_size = bs
        calls = []
        _build_schedule(x, list(range(bs)), calls)
        schedule = _pack_schedule(calls)
        return fused_tree_forward(schedule, self.f_pad, self.bc_pad, bs)

    # pure-jnp reference (no Pallas), used only to verify the fused kernel
    def forward_reference(self, x, bs):
        self.batch_size = bs
        node_list = []

        def encode_fn(ids_np):
            ids = jnp.asarray(np.asarray(ids_np, np.int32))
            emb = jnp.take(self.embedding, jnp.clip(ids, 0, VOCAB - 1), axis=0)
            emb = jnp.where((ids >= 0)[:, None], emb, 0.0)
            return (jnp.dot(emb, self.wc_t, precision=jax.lax.Precision.HIGHEST)
                    + self.bc)

        def traverse(node, batch_index):
            size = len(node)
            if not size:
                return None
            index, children_index, current_node, children = [], [], [], []
            for i in range(size):
                if node[i][0] != -1:
                    index.append(i)
                    current_node.append(node[i][0])
                    temp = node[i][1:]
                    for j in range(len(temp)):
                        if temp[j][0] != -1:
                            if len(children_index) <= j:
                                children_index.append([i]); children.append([temp[j]])
                            else:
                                children_index[j].append(i); children[j].append(temp[j])
                else:
                    batch_index[i] = -1
            ids = np.full((size,), -1, np.int32)
            for pos, i in enumerate(index):
                ids[i] = current_node[pos]
            batch_current = encode_fn(ids)
            for c in range(len(children)):
                bci = [batch_index[i] for i in children_index[c]]
                tree = traverse(children[c], bci)
                if tree is not None:
                    idx = jnp.asarray(np.asarray(children_index[c], np.int32))
                    batch_current = batch_current.at[idx].add(tree)
            kept = [i for i in batch_index if i != -1]
            if len(kept) == batch_current.shape[0]:
                b_in = jnp.asarray(np.asarray(kept, np.int32))
                node_list.append(jnp.zeros((bs, self.encode_dim), jnp.float32)
                                 .at[b_in].set(batch_current))
            return batch_current

        traverse(x, list(range(bs)))
        return jnp.max(jnp.stack(node_list, axis=0), axis=0)


# --------------------------------- main -------------------------------------

if __name__ == "__main__":
    bs = 4
    enc = BatchTreeEncoderPallas(VOCAB, EMB_DIM, ENCODE_DIM, bs, jax.random.PRNGKey(0))

    # synthetic batch of trees; node := [token_id, child_node, child_node, ...]
    # a child whose id is -1 is the "stop" marker and is skipped, as in the torch code.
    x = [
        [5, [3, [7]], [2]],
        [1, [4, [6], [2, [11]]]],
        [8, [-1], [9]],
        [10, [12], [13], [14]],
    ]

    out = jax.block_until_ready(enc.forward(x, bs))
    ref = jax.block_until_ready(enc.forward_reference(x, bs))
    np.testing.assert_allclose(np.asarray(out), np.asarray(ref), rtol=1e-4, atol=1e-4)

    print("KERNEL_OK")
</pallas_src>

<mosaic_0001>
module attributes {stable_mosaic.version = 11 : i64} {
  func.func @kernel(%arg0: memref<21xi32, #tpu.memory_space<smem>>, %arg1: memref<7xi32, #tpu.memory_space<smem>>, %arg2: memref<56x1xi32, #tpu.memory_space<vmem>>, %arg3: memref<7x8x128xi32, #tpu.memory_space<vmem>>, %arg4: memref<128x128xf32, #tpu.memory_space<vmem>>, %arg5: memref<1x128xf32, #tpu.memory_space<vmem>>, %arg6: memref<8x128xf32, #tpu.memory_space<vmem>>, %arg7: memref<56x128xf32, #tpu.memory_space<vmem>>, %arg8: memref<128x128xf32, #tpu.memory_space<vmem>>) attributes {dimension_semantics = [], scalar_prefetch = 0 : i64, scratch_operands = 2 : i64, tpu.core_type = #tpu.core_type<tc>} {
    %cst = arith.constant 0xFF800000 : f32
    %0 = vector.broadcast %cst : f32 to vector<8x128xf32>
    %c0 = arith.constant 0 : index
    %c0_0 = arith.constant 0 : index
    %1 = vector.load %arg6[%c0, %c0_0] : memref<8x128xf32, #tpu.memory_space<vmem>>, vector<8x128xf32>
    tpu.vector_store %arg6[%c0, %c0_0], %0 {strides = array<i32>} : memref<8x128xf32, #tpu.memory_space<vmem>>, vector<8x128xf32>,
    %cst_1 = arith.constant 0.000000e+00 : f32
    %2 = vector.broadcast %cst_1 : f32 to vector<128x128xf32>
    %c0_2 = arith.constant 0 : index
    %c0_3 = arith.constant 0 : index
    %3 = vector.load %arg8[%c0_2, %c0_3] : memref<128x128xf32, #tpu.memory_space<vmem>>, vector<128x128xf32>
    tpu.vector_store %arg8[%c0_2, %c0_3], %2 {strides = array<i32>} : memref<128x128xf32, #tpu.memory_space<vmem>>, vector<128x128xf32>,
    %c0_4 = arith.constant 0 : index
    %c0_5 = arith.constant 0 : index
    %4 = vector.load %arg2[%c0_4, %c0_5] : memref<56x1xi32, #tpu.memory_space<vmem>>, vector<56x1xi32>
    %5 = tpu.iota {dimensions = array<i32: 1>} : vector<56x128xi32>
    %6 = vector.broadcast %4 : vector<56x1xi32> to vector<56x128xi32>
    %7 = arith.cmpi eq, %6, %5 : vector<56x128xi32>
    %8 = arith.extui %7 : vector<56x128xi1> to vector<56x128xi32>
    %9 = arith.sitofp %8 : vector<56x128xi32> to vector<56x128xf32>
    %c0_6 = arith.constant 0 : index
    %c0_7 = arith.constant 0 : index
    %10 = vector.load %arg4[%c0_6, %c0_7] : memref<128x128xf32, #tpu.memory_space<vmem>>, vector<128x128xf32>
    %cst_8 = arith.constant dense<0.000000e+00> : vector<56x128xf32>
    %11 = tpu.matmul %9, %10, %cst_8 {dimension_numbers = #tpu.dot_dimension_numbers<[1], [0], [0], [1], [0, 0, 1, 1], [], []>} : vector<56x128xf32>, vector<128x128xf32>, vector<56x128xf32> -> vector<56x128xf32>
    %c0_9 = arith.constant 0 : index
    %c0_10 = arith.constant 0 : index
    %12 = vector.load %arg5[%c0_9, %c0_10] : memref<1x128xf32, #tpu.memory_space<vmem>>, vector<1x128xf32>
    %13 = vector.broadcast %12 : vector<1x128xf32> to vector<56x128xf32>
    %14 = arith.addf %11, %13 : vector<56x128xf32>
    %c0_11 = arith.constant 0 : index
    %c0_12 = arith.constant 0 : index
    %15 = vector.load %arg7[%c0_11, %c0_12] : memref<56x128xf32, #tpu.memory_space<vmem>>, vector<56x128xf32>
    tpu.vector_store %arg7[%c0_11, %c0_12], %14 {strides = array<i32>} : memref<56x128xf32, #tpu.memory_space<vmem>>, vector<56x128xf32>,
    %c0_i32 = arith.constant 0 : i32
    %c7_i32 = arith.constant 7 : i32
    %16 = arith.addi %c0_i32, %c7_i32 : i32
    %c1_i32 = arith.constant 1 : i32
    scf.for %arg9 = %c0_i32 to %16 step %c1_i32  : i32 {
      %c1_i32_14 = arith.constant 1 : i32
      %17 = arith.muli %arg9, %c1_i32_14 : i32
      %c0_i32_15 = arith.constant 0 : i32
      %18 = arith.addi %c0_i32_15, %17 : i32
      %19 = arith.index_cast %18 : i32 to index
      %c0_16 = arith.constant 0 : index
      %c0_17 = arith.constant 0 : index
      %20 = vector.load %arg3[%19, %c0_16, %c0_17] : memref<7x8x128xi32, #tpu.memory_space<vmem>>, vector<1x8x128xi32>
      %21 = vector.shape_cast %20 : vector<1x8x128xi32> to vector<8x128xi32>
      %c8_i32 = arith.constant 8 : i32
      %22 = arith.muli %18, %c8_i32 : i32
      %23 = tpu.assume_multiple %22, 8 : i32
      %c3_i32 = arith.constant 3 : i32
      %24 = arith.muli %18, %c3_i32 : i32
      %25 = arith.index_cast %24 : i32 to index
      %26 = memref.load %arg0[%25] : memref<21xi32, #tpu.memory_space<smem>>
      %c0_i32_18 = arith.constant 0 : i32
      %27 = arith.cmpi sge, %26, %c0_i32_18 : i32
      %28 = arith.extui %27 : i1 to i32
      %c0_i32_19 = arith.constant 0 : i32
      %29 = arith.cmpi ne, %28, %c0_i32_19 : i32
      scf.if %29 {
        %c3_i32_22 = arith.constant 3 : i32
        %35 = arith.muli %18, %c3_i32_22 : i32
        %c0_i32_23 = arith.constant 0 : i32
        %36 = arith.addi %35, %c0_i32_23 : i32
        %37 = arith.index_cast %36 : i32 to index
        %38 = memref.load %arg0[%37] : memref<21xi32, #tpu.memory_space<smem>>
        %c0_i32_24 = arith.constant 0 : i32
        %39 = arith.maxsi %38, %c0_i32_24 : i32
        %c8_i32_25 = arith.constant 8 : i32
        %40 = arith.muli %39, %c8_i32_25 : i32
        %41 = tpu.assume_multiple %40, 8 : i32
        %42 = arith.index_cast %41 : i32 to index
        %c0_26 = arith.constant 0 : index
        %43 = vector.load %arg7[%42, %c0_26] : memref<56x128xf32, #tpu.memory_space<vmem>>, vector<8x128xf32>
        %c0_27 = arith.constant 0 : index
        %c0_28 = arith.constant 0 : index
        %44 = vector.load %arg8[%c0_27, %c0_28] : memref<128x128xf32, #tpu.memory_space<vmem>>, vector<8x128xf32>
        tpu.vector_store %arg8[%c0_27, %c0_28], %43 {strides = array<i32>} : memref<128x128xf32, #tpu.memory_space<vmem>>, vector<8x128xf32>,
        %c3_i32_29 = arith.constant 3 : i32
        %45 = arith.muli %18, %c3_i32_29 : i32
        %c1_i32_30 = arith.constant 1 : i32
        %46 = arith.addi %45, %c1_i32_30 : i32
        %47 = arith.index_cast %46 : i32 to index
        %48 = memref.load %arg0[%47] : memref<21xi32, #tpu.memory_space<smem>>
        %c0_i32_31 = arith.constant 0 : i32
        %49 = arith.maxsi %48, %c0_i32_31 : i32
        %c8_i32_32 = arith.constant 8 : i32
        %50 = arith.muli %49, %c8_i32_32 : i32
        %51 = tpu.assume_multiple %50, 8 : i32
        %52 = arith.index_cast %51 : i32 to index
        %c0_33 = arith.constant 0 : index
        %53 = vector.load %arg7[%52, %c0_33] : memref<56x128xf32, #tpu.memory_space<vmem>>, vector<8x128xf32>
        %c8 = arith.constant 8 : index
        %c0_34 = arith.constant 0 : index
        %54 = vector.load %arg8[%c8, %c0_34] : memref<128x128xf32, #tpu.memory_space<vmem>>, vector<8x128xf32>
        tpu.vector_store %arg8[%c8, %c0_34], %53 {strides = array<i32>} : memref<128x128xf32, #tpu.memory_space<vmem>>, vector<8x128xf32>,
        %c3_i32_35 = arith.constant 3 : i32
        %55 = arith.muli %18, %c3_i32_35 : i32
        %c2_i32 = arith.constant 2 : i32
        %56 = arith.addi %55, %c2_i32 : i32
        %57 = arith.index_cast %56 : i32 to index
        %58 = memref.load %arg0[%57] : memref<21xi32, #tpu.memory_space<smem>>
        %c0_i32_36 = arith.constant 0 : i32
        %59 = arith.maxsi %58, %c0_i32_36 : i32
        %c8_i32_37 = arith.constant 8 : i32
        %60 = arith.muli %59, %c8_i32_37 : i32
        %61 = tpu.assume_multiple %60, 8 : i32
        %62 = arith.index_cast %61 : i32 to index
        %c0_38 = arith.constant 0 : index
        %63 = vector.load %arg7[%62, %c0_38] : memref<56x128xf32, #tpu.memory_space<vmem>>, vector<8x128xf32>
        %c16 = arith.constant 16 : index
        %c0_39 = arith.constant 0 : index
        %64 = vector.load %arg8[%c16, %c0_39] : memref<128x128xf32, #tpu.memory_space<vmem>>, vector<8x128xf32>
        tpu.vector_store %arg8[%c16, %c0_39], %63 {strides = array<i32>} : memref<128x128xf32, #tpu.memory_space<vmem>>, vector<8x128xf32>,
        %65 = vector.extract_strided_slice %21 {offsets = [0, 0], sizes = [1, 128], strides = [1, 1]} : vector<8x128xi32> to vector<1x128xi32>
        %66 = tpu.iota {dimensions = array<i32: 0>} : vector<8x128xi32>
        %67 = vector.broadcast %65 : vector<1x128xi32> to vector<8x128xi32>
        %68 = arith.cmpi eq, %66, %67 : vector<8x128xi32>
        %69 = arith.extui %68 : vector<8x128xi1> to vector<8x128xi32>
        %70 = arith.sitofp %69 : vector<8x128xi32> to vector<8x128xf32>
        %71 = arith.index_cast %23 : i32 to index
        %c0_40 = arith.constant 0 : index
        %72 = vector.load %arg7[%71, %c0_40] : memref<56x128xf32, #tpu.memory_space<vmem>>, vector<8x128xf32>
        %c0_41 = arith.constant 0 : index
        %c0_42 = arith.constant 0 : index
        %73 = vector.load %arg8[%c0_41, %c0_42] : memref<128x128xf32, #tpu.memory_space<vmem>>, vector<128x128xf32>
        %cst_43 = arith.constant dense<0.000000e+00> : vector<8x128xf32>
        %74 = tpu.matmul %70, %73, %cst_43 {dimension_numbers = #tpu.dot_dimension_numbers<[1], [0], [0], [1], [0, 0, 1, 1], [], []>} : vector<8x128xf32>, vector<128x128xf32>, vector<8x128xf32> -> vector<8x128xf32>
        %75 = arith.addf %72, %74 : vector<8x128xf32>
        %76 = arith.index_cast %23 : i32 to index
        %c0_44 = arith.constant 0 : index
        %77 = vector.load %arg7[%76, %c0_44] : memref<56x128xf32, #tpu.memory_space<vmem>>, vector<8x128xf32>
        tpu.vector_store %arg7[%76, %c0_44], %75 {strides = array<i32>} : memref<56x128xf32, #tpu.memory_space<vmem>>, vector<8x128xf32>,
      } else {
      }
      %30 = arith.index_cast %18 : i32 to index
      %31 = memref.load %arg1[%30] : memref<7xi32, #tpu.memory_space<smem>>
      %c0_i32_20 = arith.constant 0 : i32
      %32 = arith.cmpi ne, %31, %c0_i32_20 : i32
      %33 = arith.extui %32 : i1 to i32
      %c0_i32_21 = arith.constant 0 : i32
      %34 = arith.cmpi ne, %33, %c0_i32_21 : i32
      scf.if %34 {
        %35 = vector.extract_strided_slice %21 {offsets = [1, 0], sizes = [1, 8], strides = [1, 1]} : vector<8x128xi32> to vector<1x8xi32>
        %36 = tpu.iota {dimensions = array<i32: 0>} : vector<8x8xi32>
        %37 = vector.broadcast %35 : vector<1x8xi32> to vector<8x8xi32>
        %38 = arith.cmpi eq, %36, %37 : vector<8x8xi32>
        %39 = arith.extui %38 : vector<8x8xi1> to vector<8x8xi32>
        %40 = arith.sitofp %39 : vector<8x8xi32> to vector<8x8xf32>
        %41 = arith.index_cast %23 : i32 to index
        %c0_22 = arith.constant 0 : index
        %42 = vector.load %arg7[%41, %c0_22] : memref<56x128xf32, #tpu.memory_space<vmem>>, vector<8x128xf32>
        %cst_23 = arith.constant dense<0.000000e+00> : vector<8x128xf32>
        %43 = tpu.matmul %40, %42, %cst_23 {dimension_numbers = #tpu.dot_dimension_numbers<[1], [0], [0], [1], [0, 0, 1, 1], [], []>} : vector<8x8xf32>, vector<8x128xf32>, vector<8x128xf32> -> vector<8x128xf32>
        %c0_24 = arith.constant 0 : index
        %c0_25 = arith.constant 0 : index
        %44 = vector.load %arg6[%c0_24, %c0_25] : memref<8x128xf32, #tpu.memory_space<vmem>>, vector<8x128xf32>
        %45 = arith.maximumf %44, %43 : vector<8x128xf32>
        %c0_26 = arith.constant 0 : index
        %c0_27 = arith.constant 0 : index
        %46 = vector.load %arg6[%c0_26, %c0_27] : memref<8x128xf32, #tpu.memory_space<vmem>>, vector<8x128xf32>
        tpu.vector_store %arg6[%c0_26, %c0_27], %45 {strides = array<i32>} : memref<8x128xf32, #tpu.memory_space<vmem>>, vector<8x128xf32>,
      } else {
      }
    }
    %c7_i32_13 = arith.constant 7 : i32
    return
  }
}

</mosaic_0001>

<bundles_post_ra>
// kernel: tpu_custom_call.1
= control target key start
LH: loop header
LB: loop body
LE: loop exit
PB: predicated region body
PF: predicated region fallthrough
CT: control target
= control target key end

     0   :  { %11 = vsyncpa [#allocation8], 0  ;;  %s651_s0 = inlined_call_operand.vmem [shape: s32[21], index: 0, kind: input, shape index: {}]   ;;  %s652_s1 = inlined_call_operand.hbm [shape: s32[7], index: 1, kind: input, shape index: {}]   ;;  %s653_s2 = inlined_call_operand.vmem [shape: s32[56,1], index: 2, kind: input, shape index: {}]   ;;  %s654_s3 = inlined_call_operand.vmem [shape: s32[7,8,128], index: 3, kind: input, shape index: {}]   ;;  %s655_s4 = inlined_call_operand.hbm [shape: f32[128,128], index: 4, kind: input, shape index: {}]   ;;  %s656_s5 = inlined_call_operand.vmem [shape: f32[1,128], index: 5, kind: input, shape index: {}]   ;;  %s657_s6 = inlined_call_operand.hbm [shape: f32[8,128], index: 6, kind: output, shape index: {}]  }
   0x1   :  { %12 = vsyncpa [#allocation7], 0 }
   0x2   :  { %13 = vsyncpa [#allocation5], 0 }
   0x3   :  { %14 = vsyncpa [#allocation6], 0  ;;  %s20_s23 = sshll.u32 %s651_s0, 4  ;;  %s29_s26 = sshll.u32 %s652_s1, 4  ;;  %s21_s23 = int_to_ptr.vmem [resolvable:$true] %s20_s23  ;;  %s30_s26 = int_to_ptr.hbm [resolvable:$true] %s29_s26 }
   0x4   :  { %s542_s27 = smov [#allocation4]   ;;  %s543_s28 = smov [#allocation9]  }
   0x5   :  { %23 = dma.vmem_to_smem %s21_s23, 16, %s542_s27, [#allocation8]  }
   0x6   :  { %32 = dma.hbm_to_smem %s30_s26, 16, %s543_s28, [#allocation7]  }
   0x7   :  { %s41_s7 = sshll.u32 %s655_s4, 4  ;;  %s544_s8 = smov [#allocation10]   ;;  %s42_s7 = int_to_ptr.hbm [resolvable:$true] %s41_s7 }
   0x8   :  { %s43_s9 = sshll.u32 %s544_s8, 4  ;;  %s545_s10 = smov 128   ;;  %s44_s9 = int_to_ptr.vmem [resolvable:$true] %s43_s9 }
   0x9   :  { %s546_s0 = smov 8  }
   0xa   :  { %49 = dma.hbm_to_vmem [thread:$0]  %s42_s7, 2048, %s44_s9, [#allocation5], %s545_s10, %s545_s10, %s546_s0  }
   0xb   :  { %530 = dma.done.wait [#allocation8], 16  }
   0xc   :  { %531 = vsyncadd [#allocation8], 4294967280 }
   0xd   :  { %532 = dma.done.wait [#allocation7], 16  }
   0xe   :  { %533 = vsyncadd [#allocation7], 4294967280 }
   0xf   :  { %534 = dma.done.wait [#allocation5], 2048  }
  0x10   :  { %535 = vsyncadd [#allocation5], 4294965248 }
  0x11   :  { %64 = sfence }
  0x12   :  { %v85_v0 = vld [vmem:[%s653_s2 + $0x18] sm:$0xff]  ;;  %v82_v1 = vld [vmem:[%s653_s2] sm:$0xff]  ;;  %v547_v2 = vmov 0   ;;  %v88_v3 = vld [vmem:[%s653_s2 + $0x30] sm:$0xff]  ;;  %v548_v4 = vmov -inf   ;;  %v549_v8 = vmov 0.0   ;;  %v89_v26 = vlaneseq }
  0x13   :  { %451 = vset.pattern.permute.xlu1 %v547_v2  ;;  %450 = vset.pattern.permute.xlu0 %v547_v2  ;;  %65 = vst [vmem:[#allocation11] sm:$0xff] %v548_v4  ;;  %v148_v5 = vld [vmem:[#allocation10 + $0x78] sm:$0xff]  ;;  %v147_v6 = vld [vmem:[#allocation10 + $0x70] sm:$0xff]  ;;  %v146_v7 = vld [vmem:[#allocation10 + $0x68] sm:$0xff]  ;;  %v550_v31 = vmov 1.0  }
  0x14   :  { %101 = vperm.xlu0 %450, %v85_v0   ;;  %92 = vperm.xlu1 %451, %v82_v1   ;;  %69 = vst [vmem:[#allocation3 + $0x18] sm:$0xff] %v549_v8  ;;  %v145_v9 = vld [vmem:[#allocation10 + $0x60] sm:$0xff]  ;;  %v87_v10 = vld [vmem:[%s653_s2 + $0x28] sm:$0xff]  ;;  %v86_v11 = vld [vmem:[%s653_s2 + $0x20] sm:$0xff]  ;;  %v90_v28 = vand.u32 127, %v89_v26 }
  0x15   :  { %452 = vset.pattern.permute.xlu2 %v547_v2  ;;  %383 = vmatpush.msra.mxu2 %v148_v5  ;;  %70 = vst [vmem:[#allocation3 + $0x50] sm:$0xff] %v549_v8  ;;  %v144_v12 = vld [vmem:[#allocation10 + $0x58] sm:$0xff]  ;;  %v83_v13 = vld [vmem:[%s653_s2 + $0x8] sm:$0xff]  ;;  %v142_v15 = vld [vmem:[#allocation10 + $0x48] sm:$0xff] }
  0x16   :  { %110 = vperm.xlu2 %452, %v88_v3   ;;  %153 = vmatpush.msra.mxu0 %v148_v5  ;;  %71 = vst [vmem:[#allocation3 + $0x68] sm:$0xff] %v549_v8  ;;  %v143_v14 = vld [vmem:[#allocation10 + $0x50] sm:$0xff]  ;;  %v141_v16 = vld [vmem:[#allocation10 + $0x40] sm:$0xff]  ;;  %v84_v17 = vld [vmem:[%s653_s2 + $0x10] sm:$0xff] }
  0x17   :  { %386 = vmatpush.msra.mxu2 %v147_v6  ;;  %384 = vmatpush.msra.mxu3 %v148_v5  ;;  %72 = vst [vmem:[#allocation3 + $0x8] sm:$0xff] %v549_v8  ;;  %v140_v18 = vld [vmem:[#allocation10 + $0x38] sm:$0xff]  ;;  %v139_v19 = vld [vmem:[#allocation10 + $0x30] sm:$0xff]  ;;  %v138_v20 = vld [vmem:[#allocation10 + $0x28] sm:$0xff] }
  0x18   :  { %154 = vmatpush.msra.mxu0 %v147_v6  ;;  %382 = vmatpush.msra.mxu1 %v148_v5  ;;  %73 = vst [vmem:[#allocation3 + $0x48] sm:$0xff] %v549_v8  ;;  %v137_v21 = vld [vmem:[#allocation10 + $0x20] sm:$0xff]  ;;  %v136_v22 = vld [vmem:[#allocation10 + $0x18] sm:$0xff]  ;;  %v135_v23 = vld [vmem:[#allocation10 + $0x10] sm:$0xff] }
  0x19   :  { %389 = vmatpush.msra.mxu2 %v146_v7  ;;  %387 = vmatpush.msra.mxu3 %v147_v6  ;;  %74 = vst [vmem:[#allocation3 + $0x40] sm:$0xff] %v549_v8  ;;  %v134_v24 = vld [vmem:[#allocation10 + $0x8] sm:$0xff]  ;;  %v133_v25 = vld [vmem:[#allocation10] sm:$0xff] }
  0x1a   :  { %155 = vmatpush.msra.mxu0 %v146_v7  ;;  %385 = vmatpush.msra.mxu1 %v147_v6  ;;  %75 = vst [vmem:[#allocation3 + $0x20] sm:$0xff] %v549_v8  ;;  %v453_v36 = vld [vmem:[%s656_s5] ss:$0 sm:$0xff]  ;;  %s623_s5 = smov 0  }
  0x1b   :  { %392 = vmatpush.msra.mxu2 %v145_v9  ;;  %390 = vmatpush.msra.mxu3 %v146_v7  ;;  %76 = vst [vmem:[#allocation3 + $0x10] sm:$0xff] %v549_v8 }
  0x1c   :  { %107 = vperm.xlu0 %450, %v87_v10   ;;  %104 = vperm.xlu1 %451, %v86_v11   ;;  %77 = vst [vmem:[#allocation3 + $0x38] sm:$0xff] %v549_v8 }
  0x1d   :  { %395 = vmatpush.msra.mxu2 %v144_v12  ;;  %156 = vmatpush.msra.mxu0 %v145_v9  ;;  %78 = vst [vmem:[#allocation3 + $0x60] sm:$0xff] %v549_v8 }
  0x1e   :  { %95 = vperm.xlu2 %452, %v83_v13   ;;  %393 = vmatpush.msra.mxu3 %v145_v9  ;;  %79 = vst [vmem:[#allocation3 + $0x70] sm:$0xff] %v549_v8 }
  0x1f   :  { %398 = vmatpush.msra.mxu2 %v143_v14  ;;  %157 = vmatpush.msra.mxu0 %v144_v12  ;;  %80 = vst [vmem:[#allocation3 + $0x78] sm:$0xff] %v549_v8 }
  0x20   :  { %396 = vmatpush.msra.mxu3 %v144_v12  ;;  %388 = vmatpush.msra.mxu1 %v146_v7  ;;  %81 = vst [vmem:[#allocation3 + $0x28] sm:$0xff] %v549_v8 }
  0x21   :  { %401 = vmatpush.msra.mxu2 %v142_v15  ;;  %158 = vmatpush.msra.mxu0 %v143_v14 }
  0x22   :  { %399 = vmatpush.msra.mxu3 %v143_v14  ;;  %391 = vmatpush.msra.mxu1 %v145_v9 }
  0x23   :  { %404 = vmatpush.msra.mxu2 %v141_v16  ;;  %159 = vmatpush.msra.mxu0 %v142_v15 }
  0x24   :  { %98 = vperm.xlu0 %450, %v84_v17   ;;  %402 = vmatpush.msra.mxu3 %v142_v15 }
  0x25   :  { %407 = vmatpush.msra.mxu2 %v140_v18  ;;  %160 = vmatpush.msra.mxu0 %v141_v16 }
  0x26   :  { %405 = vmatpush.msra.mxu3 %v141_v16  ;;  %394 = vmatpush.msra.mxu1 %v144_v12 }
  0x27   :  { %410 = vmatpush.msra.mxu2 %v139_v19  ;;  %161 = vmatpush.msra.mxu0 %v140_v18 }
  0x28   :  { %408 = vmatpush.msra.mxu3 %v140_v18  ;;  %397 = vmatpush.msra.mxu1 %v143_v14 }
  0x29   :  { %413 = vmatpush.msra.mxu2 %v138_v20  ;;  %162 = vmatpush.msra.mxu0 %v139_v19 }
  0x2a   :  { %411 = vmatpush.msra.mxu3 %v139_v19  ;;  %400 = vmatpush.msra.mxu1 %v142_v15 }
  0x2b   :  { %416 = vmatpush.msra.mxu2 %v137_v21  ;;  %163 = vmatpush.msra.mxu0 %v138_v20 }
  0x2c   :  { %414 = vmatpush.msra.mxu3 %v138_v20  ;;  %403 = vmatpush.msra.mxu1 %v141_v16 }
  0x2d   :  { %419 = vmatpush.msra.mxu2 %v136_v22  ;;  %164 = vmatpush.msra.mxu0 %v137_v21 }
  0x2e   :  { %417 = vmatpush.msra.mxu3 %v137_v21  ;;  %406 = vmatpush.msra.mxu1 %v140_v18 }
  0x2f   :  { %422 = vmatpush.msra.mxu2 %v135_v23  ;;  %165 = vmatpush.msra.mxu0 %v136_v22 }
  0x30   :  { %420 = vmatpush.msra.mxu3 %v136_v22  ;;  %409 = vmatpush.msra.mxu1 %v139_v19 }
  0x31   :  { %425 = vmatpush.msra.mxu2 %v134_v24  ;;  %166 = vmatpush.msra.mxu0 %v135_v23 }
  0x32   :  { %423 = vmatpush.msra.mxu3 %v135_v23  ;;  %412 = vmatpush.msra.mxu1 %v138_v20 }
  0x33   :  { %167 = vmatpush.msra.mxu0 %v134_v24  ;;  %428 = vmatpush.msra.mxu2 %v133_v25 }
  0x34   :  { %426 = vmatpush.msra.mxu3 %v134_v24  ;;  %415 = vmatpush.msra.mxu1 %v137_v21 }
  0x35   :  { %168 = vmatpush.msra.mxu0 %v133_v25 }
  0x36   :  { %418 = vmatpush.msra.mxu1 %v136_v22  ;;  %429 = vmatpush.msra.mxu3 %v133_v25 }
  0x38   :  { %421 = vmatpush.msra.mxu1 %v135_v23 }
  0x3a   :  { %424 = vmatpush.msra.mxu1 %v134_v24 }
  0x3c   :  { %427 = vmatpush.msra.mxu1 %v133_v25 }
  0x70   :  { %v111_v27 = vpop.permute.xlu2 %110 }
  0x71   :  { %vm118_vm5 = vcmp.eq.s32.totalorder %v111_v27, %v90_v28 }
  0x78   :  { %v96_v32 = vpop.permute.xlu2 %95 }
  0x79   :  { %vm113_vm2 = vcmp.eq.s32.totalorder %v96_v32, %v90_v28 }
  0x86   :  { %v102_v29 = vpop.permute.xlu0 %101  ;;  %v93_v30 = vpop.permute.xlu1 %92 }
  0x87   :  { %vm115_vm0 = vcmp.eq.s32.totalorder %v102_v29, %v90_v28  ;;  %vm112_vm1 = vcmp.eq.s32.totalorder %v93_v30, %v90_v28 }
  0x88   :  { %368 = vmatmul.msk.f32.vlgmr.msra.gmra.mxu2 %vm115_vm0, %v550_v31  ;;  %365 = vmatmul.msk.f32.vlgmr.msra.gmra.mxu0 %vm112_vm1, %v550_v31 }
  0x8e   :  { %v108_v33 = vpop.permute.xlu0 %107  ;;  %v105_v34 = vpop.permute.xlu1 %104 }
  0x8f   :  { %vm117_vm3 = vcmp.eq.s32.totalorder %v108_v33, %v90_v28  ;;  %vm116_vm4 = vcmp.eq.s32.totalorder %v105_v34, %v90_v28 }
  0x90   :  { %369 = vmatmul.msk.f32.gmra.mxu2 %vm116_vm4, %v550_v31  ;;  %370 = vmatmul.msk.f32.vlgmr.msra.gmra.mxu3 %vm117_vm3, %v550_v31 }
  0x91   :  { %366 = vmatmul.msk.f32.gmra.mxu0 %vm113_vm2, %v550_v31 }
  0x96   :  { %v99_v35 = vpop.permute.xlu0 %98 }
  0x97   :  { %vm114_vm6 = vcmp.eq.s32.totalorder %v99_v35, %v90_v28 }
  0x98   :  { %367 = vmatmul.msk.f32.vlgmr.msra.gmra.mxu1 %vm114_vm6, %v550_v31  ;;  %371 = vmatmul.msk.f32.gmra.mxu3 %vm118_vm5, %v550_v31 }
 0x105   :  { %v170_v37 = vpop.f32.mrf.mxu0 }
 0x106   :  { %v171_v38 = vadd.f32 %v453_v36, %v170_v37 }
 0x108   :  { %191 = vst [vmem:[#allocation2] sm:$0xff] %v171_v38 }
 0x10b   :  { %v179_v39 = vpop.f32.mrf.mxu2 }
 0x10c   :  { %v180_v40 = vadd.f32 %v453_v36, %v179_v39 }
 0x10e   :  { %194 = vst [vmem:[#allocation2 + $0x18] sm:$0xff] %v180_v40  ;;  %v173_v41 = vpop.f32.mrf.mxu0 }
 0x10f   :  { %v174_v42 = vadd.f32 %v453_v36, %v173_v41 }
 0x111   :  { %192 = vst [vmem:[#allocation2 + $0x8] sm:$0xff] %v174_v42 }
 0x113   :  { %v182_v43 = vpop.f32.mrf.mxu2  ;;  %v185_v44 = vpop.f32.mrf.mxu3 }
 0x114   :  { %v183_v45 = vadd.f32 %v453_v36, %v182_v43  ;;  %v186_v46 = vadd.f32 %v453_v36, %v185_v44 }
 0x115   :  { %v176_v47 = vpop.f32.mrf.mxu1 }
 0x116   :  { %195 = vst [vmem:[#allocation2 + $0x20] sm:$0xff] %v183_v45  ;;  %v177_v48 = vadd.f32 %v453_v36, %v176_v47 }
 0x117   :  { %196 = vst [vmem:[#allocation2 + $0x28] sm:$0xff] %v186_v46 }
 0x118   :  { %193 = vst [vmem:[#allocation2 + $0x10] sm:$0xff] %v177_v48 }
 0x11b   :  { %v188_v49 = vpop.f32.mrf.mxu3 }
 0x11c   :  { %v189_v50 = vadd.f32 %v453_v36, %v188_v49 }
 0x11e   :  { %197 = vst [vmem:[#allocation2 + $0x30] sm:$0xff] %v189_v50 }
 0x11f LB: > { %s629_s24 = sshll.u32 %s540_s5, 3  ;;  %s207_s25 = smul.u32 3, %s540_s5  ;;  %s540_s5 = sphi %s623_s5, %s203_s5  }
 0x120   : > { %s205_s28 = scalar_lea.vmem %s654_s3, %s629_s24 }
 0x121   : > { %v636_v51 = vld [vmem:[%s205_s28] sm:$0xff]  ;;  %s208_s29 = sld [smem:[#allocation4 + %s207_s25]] }
 0x127   : > { %p373_p0 = scmp.lt.s32.totalorder %s208_s29, 0 }
 0x128   : > { %s228_s30 = sadd.s32 (!%p373_p0), 2, %s207_s25  ;;  %s220_s7 = sadd.s32 (!%p373_p0), 1, %s207_s25 }
 0x129   : > { %212 = sbr.rel (%p373_p0) target bundleno = 463 (0x1cf), region = 48  ;;  %s229_s8 = sld [smem:[#allocation4 + %s228_s30]] (!%p373_p0) }
 0x12a   : > { %s221_s9 = sld [smem:[#allocation4 + %s220_s7]] (!%p373_p0)  ;;  %s242_s14 = scalar_lea.vmem (!%p373_p0), [#allocation2], %s629_s24 }
 0x12b   : > { %s213_s10 = sld [smem:[#allocation4 + %s207_s25]] (!%p373_p0) }
 0x12e   : > { %v259_v52 = vld [vmem:[#allocation3 + $0x28] sm:$0xff]  ;;  %v258_v53 = vld [vmem:[#allocation3 + $0x78] sm:$0xff]  ;;  %v257_v54 = vld [vmem:[#allocation3 + $0x70] sm:$0xff]  ;;  %v237_v4 = vshrl.u32 %v89_v26, 7  ;;  %v238_v5 = vperm.slane %v636_v51, 0  ;;  %v551_v6 = vmov 1.0  }
 0x12f   : > { %260 = vmatpush.msra.mxu0 %v259_v52  ;;  %v256_v55 = vld [vmem:[#allocation3 + $0x60] sm:$0xff]  ;;  %v255_v56 = vld [vmem:[#allocation3 + $0x38] sm:$0xff]  ;;  %p230_p1 = scmp.gt.s32.totalorder %s229_s8, 0  ;;  %v254_v57 = vld [vmem:[#allocation3 + $0x10] sm:$0xff] }
 0x130   : > { %p222_p2 = scmp.gt.s32.totalorder %s221_s9, 0  ;;  %v253_v58 = vld [vmem:[#allocation3 + $0x20] sm:$0xff]  ;;  %v251_v61 = vld [vmem:[#allocation3 + $0x48] sm:$0xff]  ;;  %v248_v2 = vld [vmem:[#allocation3 + $0x50] sm:$0xff]  ;;  %vm239_vm7 = vcmp.eq.s32.totalorder %v237_v4, %v238_v5 }
 0x131   : > { %261 = vmatpush.msra.mxu0 %v258_v53  ;;  %s659_s8 = smov (!%p230_p1, %s229_s8), 0  ;;  %p214_p3 = scmp.gt.s32.totalorder %s213_s10, 0  ;;  %v252_v59 = vld [vmem:[#allocation3 + $0x40] sm:$0xff]  ;;  %v250_v63 = vld [vmem:[#allocation3 + $0x8] sm:$0xff]  ;;  %v247_v3 = vld [vmem:[#allocation3 + $0x18] sm:$0xff] }
 0x132   : > { %s661_s9 = smov (!%p222_p2, %s221_s9), 0  ;;  %s376_s0 = sshll.u32 %s659_s8, 3  ;;  %v249_v0 = vld [vmem:[#allocation3 + $0x68] sm:$0xff] }
 0x133   : > { %262 = vmatpush.msra.mxu0 %v257_v54  ;;  %s375_s1 = sshll.u32 %s661_s9, 3  ;;  %s233_s11 = scalar_lea.vmem [#allocation2], %s376_s0  ;;  %v243_v7 = vld [vmem:[%s242_s14] sm:$0xff] }
 0x134   : > { %v234_v60 = vld [vmem:[%s233_s11] sm:$0xff]  ;;  %s225_s12 = scalar_lea.vmem [#allocation2], %s375_s1  ;;  %s663_s10 = smov (!%p214_p3, %s213_s10), 0 }
 0x135   : > { %263 = vmatpush.msra.mxu0 %v256_v55  ;;  %v226_v62 = vld [vmem:[%s225_s12] sm:$0xff]  ;;  %s374_s4 = sshll.u32 %s663_s10, 3 }
 0x136   : > { %s217_s13 = scalar_lea.vmem [#allocation2], %s374_s4 }
 0x137   : > { %264 = vmatpush.msra.mxu0 %v255_v56  ;;  %v218_v1 = vld [vmem:[%s217_s13] sm:$0xff] }
 0x139   : > { %265 = vmatpush.msra.mxu0 %v254_v57 }
 0x13b   : > { %266 = vmatpush.msra.mxu0 %v253_v58 }
 0x13d   : > { %267 = vmatpush.msra.mxu0 %v252_v59 }
 0x13f   : > { %268 = vmatpush.msra.mxu0 %v251_v61 }
 0x141   : > { %269 = vmatpush.msra.mxu0 %v250_v63 }
 0x143   : > { %270 = vmatpush.msra.mxu0 %v249_v0 }
 0x145   : > { %271 = vmatpush.msra.mxu0 %v248_v2 }
 0x147   : > { %272 = vmatpush.msra.mxu0 %v247_v3 }
 0x149   : > { %273 = vmatpush.msra.mxu0 %v234_v60 }
 0x14b   : > { %274 = vmatpush.msra.mxu0 %v226_v62 }
 0x14d   : > { %275 = vmatpush.msra.mxu0 %v218_v1 }
 0x14e   : > { %378 = vmatmul.msk.f32.vlgmr.msra.gmra.mxu0 %vm239_vm7, %v551_v6 }
 0x1cb   : > { %v277_v8 = vpop.f32.mrf.mxu0 }
 0x1cc   : > { %v280_v9 = vadd.f32 %v277_v8, %v243_v7 }
 0x1ce   : > { %281 = vst [vmem:[%s242_s14] sm:$0xff] %v280_v9 }
 0x1cf PF: > { %s282_s15 = sld [smem:[#allocation9 + %s540_s5]] }
 0x1d5   : > { %p379_p4 = scmp.eq.s32.totalorder %s282_s15, 0 }
 0x1d6   : > { %s293_s16 = scalar_lea.vmem (!%p379_p4), [#allocation2], %s629_s24 }
 0x1d7   : > { %286 = sbr.rel (%p379_p4) target bundleno = 609 (0x261), region = 52 }
 0x1dc   : > { %v288_v10 = vshrl.u32 %v89_v26, 7  ;;  %v289_v11 = vperm.slane %v636_v51, 1  ;;  %v294_v12 = vld [vmem:[%s293_s16] sm:$0xff]  ;;  %vm295_vm8 = vcmask 64512   ;;  %v552_v13 = vmov 0.0   ;;  %v319_v15 = vld [vmem:[#allocation11] sm:$0xff] }
 0x1dd   : > { %314 = vmatpush.msra.mxu0 %v294_v12 }
 0x1de   : > { %vm290_vm9 = vcmp.eq.s32.totalorder %v288_v10, %v289_v11 }
 0x1df   : > { %v380_v14 = vsel %vm290_vm9, 1.0, %v552_v13 }
 0x1e0   : > { %381 = vmatmul.msk.f32.vlgmr.msra.gmra.mxu0 %vm295_vm8, %v380_v14 }
 0x25d   : > { %v316_v16 = vpop.f32.mrf.mxu0 }
 0x25e   : > { %v320_v17 = vmax.f32 %v319_v15, %v316_v16 }
 0x260   : > { %321 = vst [vmem:[#allocation11] sm:$0xff] %v320_v17 }
 0x261 PF: > { %s203_s5 = sadd.s32 1, %s540_s5  }
 0x262   : > { %p200_p5 = scmp.ge.s32.totalorder %s203_s5, 7  }
 0x263   :  { %s329_s19 = sshll.u32 (%p200_p5), %s657_s6, 4  ;;  %s553_s20 = smov (%p200_p5), [#allocation11]   ;;  %s330_s19 = int_to_ptr.hbm [resolvable:$true] %s329_s19 }
 0x264   :  { %202 = sbr.rel (!%p200_p5) target bundleno = 287 (0x11f), region = 77  ;;  %s327_s21 = sshll.u32 (%p200_p5), %s553_s20, 4  ;;  %s328_s21 = int_to_ptr.vmem [resolvable:$true] %s327_s21 }
 0x265   :  { %332 = dma.vmem_to_hbm [thread:$0]  (%p200_p5), %s328_s21, 128, %s330_s19, [#allocation6]  }
 0x269   :  { %536 = dma.done.wait [#allocation6], 128  }
 0x26a   :  { %537 = vsyncadd [#allocation6], 4294967168 }
 0x26b   :  { %337 = vsyncpa [#allocation5], 1 }
 0x26c   :  { %338 = vsyncpa [#allocation6], 1 }
 0x26d   :  { %339 = vsyncpa [#allocation7], 1 }
 0x26e   :  { %340 = vsyncpa [#allocation8], 1 }

</bundles_post_ra>
